<compile_context>
chip_gen: v5e
topology: v5e:2x2
jax: 0.10.0
libtpu: 0.0.40
codegen_flags: <defaults>
</compile_context>

<pallas_src>
import jax
import jax.numpy as jnp
from jax.experimental import pallas as pl
from jax.experimental.pallas import tpu as pltpu

LOG_SIG_MAX = 2.0
LOG_SIG_MIN = -20.0

N_STATES = 600    # forced by the fc2(state) call in the reference forward
HIDDEN1 = 600
HIDDEN2 = 300
N_ACTIONS = 8
BATCH = 2

# Padded (lane / sublane friendly) shapes
PAD_IN = 640      # 5 * 128
PAD_H = 384       # 3 * 128
PAD_OUT = 128     # fused heads: [0:8]=mean, [8:16]=log_std, rest zero padding
PAD_B = 8         # sublane height


def actor_kernel(x_ref, w2_ref, b2_ref, wh_ref, bh_ref, out_ref):
    # x: (PAD_B, PAD_IN) f32 -> bf16 for the MXU; weights already bf16.
    x = x_ref[...].astype(jnp.bfloat16)

    # prob = relu(fc2(state))   (fc1 output is dead code in the reference forward)
    h = jnp.dot(x, w2_ref[...], preferred_element_type=jnp.float32) + b2_ref[...]
    h = jnp.maximum(h, 0.0)                                    # (PAD_B, PAD_H) f32

    # Fused heads: [mean | log_std | zero-pad] in one lane-dense matmul.
    out = jnp.dot(h.astype(jnp.bfloat16), wh_ref[...],
                  preferred_element_type=jnp.float32) + bh_ref[...]  # (PAD_B, PAD_OUT)

    # Clamp only the log_std columns [N_ACTIONS, 2*N_ACTIONS); mean stays untouched.
    col = jax.lax.broadcasted_iota(jnp.int32, out.shape, 1)
    is_logstd = (col >= N_ACTIONS) & (col < 2 * N_ACTIONS)
    out = jnp.where(is_logstd, jnp.clip(out, LOG_SIG_MIN, LOG_SIG_MAX), out)

    out_ref[...] = out.astype(out_ref.dtype)


def pack_params(p):
    """One-time packing: transpose, zero-pad, cast weights to bf16. Not on the hot path."""
    w2 = jnp.zeros((PAD_IN, PAD_H), jnp.float32)
    w2 = w2.at[:HIDDEN1, :HIDDEN2].set(p["w2"].T)          # (600,300) -> (640,384)
    w2 = w2.astype(jnp.bfloat16)

    b2 = jnp.zeros((1, PAD_H), jnp.float32)
    b2 = b2.at[0, :HIDDEN2].set(p["b2"])

    wh = jnp.zeros((PAD_H, PAD_OUT), jnp.float32)
    wh = wh.at[:HIDDEN2, :N_ACTIONS].set(p["wm"].T)        # mean head
    wh = wh.at[:HIDDEN2, N_ACTIONS:2 * N_ACTIONS].set(p["ws"].T)  # log_std head
    wh = wh.astype(jnp.bfloat16)

    bh = jnp.zeros((1, PAD_OUT), jnp.float32)
    bh = bh.at[0, :N_ACTIONS].set(p["bm"])
    bh = bh.at[0, N_ACTIONS:2 * N_ACTIONS].set(p["bs"])

    return dict(w2=w2, b2=b2, wh=wh, bh=bh)


def actor_forward(state, packed):
    """state: (B, N_STATES) float32 -> (mean, log_std), each (B, N_ACTIONS)."""
    B = state.shape[0]
    Bp = max(PAD_B, ((B + PAD_B - 1) // PAD_B) * PAD_B)

    # Pad batch to 8 sublanes and features to 640 lanes (cheap: a few KB).
    xp = jnp.zeros((Bp, PAD_IN), jnp.float32).at[:B, :N_STATES].set(state)

    vmem = pl.BlockSpec(memory_space=pltpu.MemorySpace.VMEM)
    flops = 2 * Bp * (PAD_IN * PAD_H + PAD_H * PAD_OUT)
    bytes_accessed = (PAD_IN * PAD_H + PAD_H * PAD_OUT) * 2 \
        + (PAD_H + PAD_OUT) * 4 + Bp * (PAD_IN + PAD_OUT) * 4

    out = pl.pallas_call(
        actor_kernel,
        out_shape=jax.ShapeDtypeStruct((Bp, PAD_OUT), jnp.float32),
        in_specs=[vmem] * 5,
        out_specs=vmem,
        cost_estimate=pl.CostEstimate(
            flops=flops, transcendentals=0, bytes_accessed=bytes_accessed),
    )(xp, packed["w2"], packed["b2"], packed["wh"], packed["bh"])

    mean = out[:B, :N_ACTIONS]
    log_std = out[:B, N_ACTIONS:2 * N_ACTIONS]
    return mean, log_std


def init_params(key):
    """PyTorch nn.Linear default init: U(-1/sqrt(fan_in), 1/sqrt(fan_in)), (out, in) layout."""
    def linear(k, fan_in, fan_out):
        kw, kb = jax.random.split(k)
        bound = 1.0 / jnp.sqrt(fan_in)
        w = jax.random.uniform(kw, (fan_out, fan_in), jnp.float32, -bound, bound)
        b = jax.random.uniform(kb, (fan_out,), jnp.float32, -bound, bound)
        return w, b

    k1, k2, k3, k4 = jax.random.split(key, 4)
    w1, b1 = linear(k1, N_STATES, HIDDEN1)   # fc1: initialized but unused (matches reference bug)
    w2, b2 = linear(k2, HIDDEN1, HIDDEN2)    # fc2
    wm, bm = linear(k3, HIDDEN2, N_ACTIONS)  # mean head
    ws, bs = linear(k4, HIDDEN2, N_ACTIONS)  # log_std head
    return dict(w1=w1, b1=b1, w2=w2, b2=b2, wm=wm, bm=bm, ws=ws, bs=bs)


def reference_forward(state, p):
    # Pure-JAX f32 reference reproducing the PyTorch forward (including the fc2(state) quirk).
    _ = jax.nn.relu(state @ p["w1"].T + p["b1"])          # dead code, as in PyTorch
    prob = jax.nn.relu(state @ p["w2"].T + p["b2"])
    mean = prob @ p["wm"].T + p["bm"]
    log_std = jnp.clip(prob @ p["ws"].T + p["bs"], LOG_SIG_MIN, LOG_SIG_MAX)
    return mean, log_std


if __name__ == "__main__":
    key = jax.random.PRNGKey(0)
    k_params, k_state = jax.random.split(key)
    params = init_params(k_params)
    packed = pack_params(params)            # one-time bf16 packing, off the hot path
    state = jax.random.normal(k_state, (BATCH, N_STATES), jnp.float32)

    mean, log_std = actor_forward(state, packed)
    jax.block_until_ready((mean, log_std))

    ref_mean, ref_log_std = reference_forward(state, params)
    assert mean.shape == (BATCH, N_ACTIONS) and log_std.shape == (BATCH, N_ACTIONS)
    # bf16 weights -> looser tolerance vs. the f32 reference.
    assert jnp.allclose(mean, ref_mean, atol=5e-2, rtol=5e-2), \
        f"mean mismatch: max abs diff {jnp.max(jnp.abs(mean - ref_mean))}"
    assert jnp.allclose(log_std, ref_log_std, atol=5e-2, rtol=5e-2), \
        f"log_std mismatch: max abs diff {jnp.max(jnp.abs(log_std - ref_log_std))}"

    print("KERNEL_OK")
</pallas_src>

<mosaic_0001>
module attributes {stable_mosaic.version = 11 : i64} {
  func.func @actor_kernel(%arg0: memref<8x640xf32, #tpu.memory_space<vmem>>, %arg1: memref<640x384xbf16, #tpu.memory_space<vmem>>, %arg2: memref<1x384xf32, #tpu.memory_space<vmem>>, %arg3: memref<384x128xbf16, #tpu.memory_space<vmem>>, %arg4: memref<1x128xf32, #tpu.memory_space<vmem>>, %arg5: memref<8x128xf32, #tpu.memory_space<vmem>>) attributes {dimension_semantics = [], scalar_prefetch = 0 : i64, scratch_operands = 0 : i64, tpu.core_type = #tpu.core_type<tc>} {
    %c0 = arith.constant 0 : index
    %c0_0 = arith.constant 0 : index
    %0 = vector.load %arg0[%c0, %c0_0] : memref<8x640xf32, #tpu.memory_space<vmem>>, vector<8x640xf32>
    %1 = arith.truncf %0 : vector<8x640xf32> to vector<8x640xbf16>
    %c0_1 = arith.constant 0 : index
    %c0_2 = arith.constant 0 : index
    %2 = vector.load %arg1[%c0_1, %c0_2] : memref<640x384xbf16, #tpu.memory_space<vmem>>, vector<640x384xbf16>
    %cst = arith.constant dense<0.000000e+00> : vector<8x384xf32>
    %3 = tpu.matmul %1, %2, %cst {dimension_numbers = #tpu.dot_dimension_numbers<[1], [0], [0], [1], [0, 0, 1, 1], [], []>} : vector<8x640xbf16>, vector<640x384xbf16>, vector<8x384xf32> -> vector<8x384xf32>
    %c0_3 = arith.constant 0 : index
    %c0_4 = arith.constant 0 : index
    %4 = vector.load %arg2[%c0_3, %c0_4] : memref<1x384xf32, #tpu.memory_space<vmem>>, vector<1x384xf32>
    %5 = vector.broadcast %4 : vector<1x384xf32> to vector<8x384xf32>
    %6 = arith.addf %3, %5 : vector<8x384xf32>
    %cst_5 = arith.constant 0.000000e+00 : f32
    %7 = vector.broadcast %cst_5 : f32 to vector<8x384xf32>
    %8 = arith.maximumf %6, %7 : vector<8x384xf32>
    %9 = arith.truncf %8 : vector<8x384xf32> to vector<8x384xbf16>
    %c0_6 = arith.constant 0 : index
    %c0_7 = arith.constant 0 : index
    %10 = vector.load %arg3[%c0_6, %c0_7] : memref<384x128xbf16, #tpu.memory_space<vmem>>, vector<384x128xbf16>
    %cst_8 = arith.constant dense<0.000000e+00> : vector<8x128xf32>
    %11 = tpu.matmul %9, %10, %cst_8 {dimension_numbers = #tpu.dot_dimension_numbers<[1], [0], [0], [1], [0, 0, 1, 1], [], []>} : vector<8x384xbf16>, vector<384x128xbf16>, vector<8x128xf32> -> vector<8x128xf32>
    %c0_9 = arith.constant 0 : index
    %c0_10 = arith.constant 0 : index
    %12 = vector.load %arg4[%c0_9, %c0_10] : memref<1x128xf32, #tpu.memory_space<vmem>>, vector<1x128xf32>
    %13 = vector.broadcast %12 : vector<1x128xf32> to vector<8x128xf32>
    %14 = arith.addf %11, %13 : vector<8x128xf32>
    %15 = tpu.iota {dimensions = array<i32: 1>} : vector<8x128xi32>
    %c8_i32 = arith.constant 8 : i32
    %16 = vector.broadcast %c8_i32 : i32 to vector<8x128xi32>
    %17 = arith.cmpi sge, %15, %16 : vector<8x128xi32>
    %c16_i32 = arith.constant 16 : i32
    %18 = vector.broadcast %c16_i32 : i32 to vector<8x128xi32>
    %19 = arith.cmpi slt, %15, %18 : vector<8x128xi32>
    %20 = arith.andi %17, %19 : vector<8x128xi1>
    %cst_11 = arith.constant -2.000000e+01 : f32
    %cst_12 = arith.constant 2.000000e+00 : f32
    %21 = vector.broadcast %cst_11 : f32 to vector<8x128xf32>
    %22 = arith.maximumf %21, %14 : vector<8x128xf32>
    %23 = vector.broadcast %cst_12 : f32 to vector<8x128xf32>
    %24 = arith.minimumf %23, %22 : vector<8x128xf32>
    %25 = arith.select %20, %24, %14 : vector<8x128xi1>, vector<8x128xf32>
    %c0_13 = arith.constant 0 : index
    %c0_14 = arith.constant 0 : index
    %26 = vector.load %arg5[%c0_13, %c0_14] : memref<8x128xf32, #tpu.memory_space<vmem>>, vector<8x128xf32>
    tpu.vector_store %arg5[%c0_13, %c0_14], %25 {strides = array<i32>} : memref<8x128xf32, #tpu.memory_space<vmem>>, vector<8x128xf32>,
    return
  }
}

</mosaic_0001>

<bundles_post_ra>
// kernel: tpu_custom_call.1
= control target key start
LH: loop header
LB: loop body
LE: loop exit
PB: predicated region body
PF: predicated region fallthrough
CT: control target
= control target key end

     0   :  { %10 = vsyncpa [#allocation3], 0  ;;  %s2307_s0 = inlined_call_operand.hbm [shape: f32[8,640], index: 0, kind: input, shape index: {}]   ;;  %s2308_s1 = inlined_call_operand.hbm [shape: bf16[640,384], index: 1, kind: input, shape index: {}]   ;;  %s2309_s2 = inlined_call_operand.hbm [shape: f32[1,384], index: 2, kind: input, shape index: {}]   ;;  %s2310_s3 = inlined_call_operand.hbm [shape: bf16[384,128], index: 3, kind: input, shape index: {}]   ;;  %s2311_s4 = inlined_call_operand.vmem [shape: f32[1,128], index: 4, kind: input, shape index: {}]   ;;  %s2312_s5 = inlined_call_operand.hbm [shape: f32[8,128], index: 5, kind: output, shape index: {}]  }
   0x1   :  { %11 = vsyncpa [#allocation6], 0 }
   0x2   :  { %12 = vsyncpa [#allocation9], 0  ;;  %s29_s20 = sshll.u32 %s2308_s1, 4  ;;  %s30_s20 = int_to_ptr.hbm [resolvable:$true] %s29_s20 }
   0x3   :  { %13 = vsyncpa [#allocation4], 0  ;;  %s2220_s21 = smov [#allocation5]   ;;  %s19_s25 = sshll.u32 %s2307_s0, 4  ;;  %s20_s25 = int_to_ptr.hbm [resolvable:$true] %s19_s25 }
   0x4   :  { %s31_s22 = sshll.u32 %s2220_s21, 4  ;;  %s2221_s26 = smov 192   ;;  %s32_s22 = int_to_ptr.vmem [resolvable:$true] %s31_s22 }
   0x5   :  { %s2222_s27 = smov 12   ;;  %s2223_s28 = smov [#allocation2]  }
   0x6   :  { %37 = dma.hbm_to_vmem [thread:$0]  %s30_s20, 15360, %s32_s22, [#allocation6], %s2221_s26, %s2221_s26, %s2222_s27  }
   0x7   :  { %s21_s29 = sshll.u32 %s2223_s28, 4  ;;  %s43_s7 = sshll.u32 %s2309_s2, 4  ;;  %s22_s29 = int_to_ptr.vmem [resolvable:$true] %s21_s29  ;;  %s44_s7 = int_to_ptr.hbm [resolvable:$true] %s43_s7 }
   0x8   :  { %24 = dma.hbm_to_vmem [thread:$0]  %s20_s25, 640, %s22_s29, [#allocation3]  }
   0x9   :  { %s53_s9 = sshll.u32 %s2310_s3, 4  ;;  %s2224_s10 = smov [#allocation7]   ;;  %s54_s9 = int_to_ptr.hbm [resolvable:$true] %s53_s9 }
   0xa   :  { %s45_s11 = sshll.u32 %s2224_s10, 4  ;;  %s2225_s0 = smov [#allocation8]   ;;  %s46_s11 = int_to_ptr.vmem [resolvable:$true] %s45_s11 }
   0xb   :  { %48 = dma.hbm_to_vmem [thread:$0]  %s44_s7, 48, %s46_s11, [#allocation6]  }
   0xc   :  { %s55_s12 = sshll.u32 %s2225_s0, 4  ;;  %s2226_s13 = smov 64   ;;  %s56_s12 = int_to_ptr.vmem [resolvable:$true] %s55_s12 }
   0xd   :  { %s2227_s14 = smov 4  }
   0xe   :  { %61 = dma.hbm_to_vmem [thread:$0]  %s54_s9, 3072, %s56_s12, [#allocation9], %s2226_s13, %s2226_s13, %s2227_s14  }
   0xf   :  { %2212 = dma.done.wait [#allocation3], 640  }
  0x10   :  { %2213 = vsyncadd [#allocation3], 4294966656 }
  0x11   :  { %2214 = dma.done.wait [#allocation6], 15408  }
  0x12   :  { %2215 = vsyncadd [#allocation6], 4294951888 }
  0x13   :  { %2216 = dma.done.wait [#allocation9], 3072  }
  0x14   :  { %2217 = vsyncadd [#allocation9], 4294964224  ;;  %v1448_v0 = vld [vmem:[#allocation5 + $0xa8] sm:$0xf]  ;;  %v1960_v1 = vld [vmem:[#allocation5 + $0xb0] sm:$0xf0] }
  0x15   :  { %v1544_v2 = vld [vmem:[#allocation5 + $0x168] sm:$0xf]  ;;  %v1449_v3 = vor.u32 %v1960_v1, %v1448_v0  ;;  %v1984_v4 = vld [vmem:[#allocation5 + $0x170] sm:$0xf0]  ;;  %v1436_v9 = vld [vmem:[#allocation5 + $0x90] sm:$0xf] }
  0x16   :  { %v1640_v5 = vld [vmem:[#allocation5 + $0x228] sm:$0xf]  ;;  %v2008_v6 = vld [vmem:[#allocation5 + $0x230] sm:$0xf0]  ;;  %v1545_v7 = vor.u32 %v1984_v4, %v1544_v2  ;;  %v1957_v10 = vld [vmem:[#allocation5 + $0x98] sm:$0xf0] }
  0x17   :  { %v1641_v8 = vor.u32 %v2008_v6, %v1640_v5  ;;  %v1532_v11 = vld [vmem:[#allocation5 + $0x150] sm:$0xf]  ;;  %898 = vmatpush.bf16.msra.mxu0 %v1449_v3  ;;  %v1437_v12 = vor.u32 %v1957_v10, %v1436_v9  ;;  %v1981_v13 = vld [vmem:[#allocation5 + $0x158] sm:$0xf0]  ;;  %v1424_v18 = vld [vmem:[#allocation5 + $0x78] sm:$0xf] }
  0x18   :  { %v1628_v14 = vld [vmem:[#allocation5 + $0x210] sm:$0xf]  ;;  %v2005_v15 = vld [vmem:[#allocation5 + $0x218] sm:$0xf0]  ;;  %911 = vmatpush.bf16.msra.mxu1 %v1545_v7  ;;  %v1533_v16 = vor.u32 %v1981_v13, %v1532_v11  ;;  %v1954_v19 = vld [vmem:[#allocation5 + $0x80] sm:$0xf0] }
  0x19   :  { %924 = vmatpush.bf16.msra.mxu2 %v1641_v8  ;;  %v1629_v17 = vor.u32 %v2005_v15, %v1628_v14  ;;  %v1520_v20 = vld [vmem:[#allocation5 + $0x138] sm:$0xf]  ;;  %v1978_v21 = vld [vmem:[#allocation5 + $0x140] sm:$0xf0]  ;;  %v1425_v24 = vor.u32 %v1954_v19, %v1424_v18  ;;  %v1412_v25 = vld [vmem:[#allocation5 + $0x60] sm:$0xf] }
  0x1a   :  { %v1616_v22 = vld [vmem:[#allocation5 + $0x1f8] sm:$0xf]  ;;  %v2002_v23 = vld [vmem:[#allocation5 + $0x200] sm:$0xf0]  ;;  %v1951_v26 = vld [vmem:[#allocation5 + $0x68] sm:$0xf0]  ;;  %v1521_v27 = vor.u32 %v1978_v21, %v1520_v20 }
  0x1b   :  { %899 = vmatpush.bf16.msra.mxu0 %v1437_v12  ;;  %v1617_v28 = vor.u32 %v2002_v23, %v1616_v22  ;;  %v1508_v29 = vld [vmem:[#allocation5 + $0x120] sm:$0xf]  ;;  %v1736_v30 = vld [vmem:[#allocation5 + $0x2e8] sm:$0xf]  ;;  %v2032_v31 = vld [vmem:[#allocation5 + $0x2f0] sm:$0xf0]  ;;  %v1413_v37 = vor.u32 %v1951_v26, %v1412_v25 }
  0x1c   :  { %912 = vmatpush.bf16.msra.mxu1 %v1533_v16  ;;  %v1975_v32 = vld [vmem:[#allocation5 + $0x128] sm:$0xf0]  ;;  %v1604_v33 = vld [vmem:[#allocation5 + $0x1e0] sm:$0xf]  ;;  %v1737_v35 = vor.u32 %v2032_v31, %v1736_v30  ;;  %v1724_v36 = vld [vmem:[#allocation5 + $0x2d0] sm:$0xf] }
  0x1d   :  { %925 = vmatpush.bf16.msra.mxu2 %v1629_v17  ;;  %v1999_v34 = vld [vmem:[#allocation5 + $0x1e8] sm:$0xf0]  ;;  %v1400_v38 = vld [vmem:[#allocation5 + $0x48] sm:$0xf]  ;;  %v1948_v39 = vld [vmem:[#allocation5 + $0x50] sm:$0xf0]  ;;  %v1509_v41 = vor.u32 %v1975_v32, %v1508_v29 }
  0x1e   :  { %937 = vmatpush.bf16.msra.mxu3 %v1737_v35  ;;  %v2029_v40 = vld [vmem:[#allocation5 + $0x2d8] sm:$0xf0]  ;;  %v1605_v42 = vor.u32 %v1999_v34, %v1604_v33  ;;  %v1496_v43 = vld [vmem:[#allocation5 + $0x108] sm:$0xf]  ;;  %v1972_v44 = vld [vmem:[#allocation5 + $0x110] sm:$0xf0]  ;;  %v1401_v50 = vor.u32 %v1948_v39, %v1400_v38 }
  0x1f   :  { %900 = vmatpush.bf16.msra.mxu0 %v1425_v24  ;;  %v1592_v45 = vld [vmem:[#allocation5 + $0x1c8] sm:$0xf]  ;;  %v1725_v46 = vor.u32 %v2029_v40, %v1724_v36  ;;  %v1996_v47 = vld [vmem:[#allocation5 + $0x1d0] sm:$0xf0]  ;;  %v1712_v48 = vld [vmem:[#allocation5 + $0x2b8] sm:$0xf]  ;;  %v1497_v54 = vor.u32 %v1972_v44, %v1496_v43 }
  0x20   :  { %913 = vmatpush.bf16.msra.mxu1 %v1521_v27  ;;  %v2026_v49 = vld [vmem:[#allocation5 + $0x2c0] sm:$0xf0]  ;;  %v1388_v51 = vld [vmem:[#allocation5 + $0x30] sm:$0xf]  ;;  %v1945_v52 = vld [vmem:[#allocation5 + $0x38] sm:$0xf0]  ;;  %v1593_v55 = vor.u32 %v1996_v47, %v1592_v45 }
  0x21   :  { %926 = vmatpush.bf16.msra.mxu2 %v1617_v28  ;;  %v1713_v53 = vor.u32 %v2026_v49, %v1712_v48  ;;  %v1484_v56 = vld [vmem:[#allocation5 + $0xf0] sm:$0xf]  ;;  %v1700_v57 = vld [vmem:[#allocation5 + $0x2a0] sm:$0xf]  ;;  %v2023_v58 = vld [vmem:[#allocation5 + $0x2a8] sm:$0xf0]  ;;  %v1389_v62 = vor.u32 %v1945_v52, %v1388_v51 }
  0x22   :  { %938 = vmatpush.bf16.msra.mxu3 %v1725_v46  ;;  %v1969_v59 = vld [vmem:[#allocation5 + $0xf8] sm:$0xf0]  ;;  %v1580_v60 = vld [vmem:[#allocation5 + $0x1b0] sm:$0xf]  ;;  %v1376_v63 = vld [vmem:[#allocation5 + $0x18] sm:$0xf]  ;;  %v1701_v1 = vor.u32 %v2023_v58, %v1700_v57 }
  0x23   :  { %901 = vmatpush.bf16.msra.mxu0 %v1413_v37  ;;  %v1993_v61 = vld [vmem:[#allocation5 + $0x1b8] sm:$0xf0]  ;;  %v1942_v0 = vld [vmem:[#allocation5 + $0x20] sm:$0xf0]  ;;  %v1485_v2 = vor.u32 %v1969_v59, %v1484_v56  ;;  %v1472_v4 = vld [vmem:[#allocation5 + $0xd8] sm:$0xf] }
  0x24   :  { %914 = vmatpush.bf16.msra.mxu1 %v1509_v41  ;;  %v1581_v3 = vor.u32 %v1993_v61, %v1580_v60  ;;  %v1966_v5 = vld [vmem:[#allocation5 + $0xe0] sm:$0xf0]  ;;  %v1688_v6 = vld [vmem:[#allocation5 + $0x288] sm:$0xf]  ;;  %v1568_v7 = vld [vmem:[#allocation5 + $0x198] sm:$0xf]  ;;  %v1377_v10 = vor.u32 %v1942_v0, %v1376_v63 }
  0x25   :  { %927 = vmatpush.bf16.msra.mxu2 %v1605_v42  ;;  %v1990_v8 = vld [vmem:[#allocation5 + $0x1a0] sm:$0xf0]  ;;  %v2020_v9 = vld [vmem:[#allocation5 + $0x290] sm:$0xf0]  ;;  %v1364_v11 = vld [vmem:[#allocation5] sm:$0xf]  ;;  %v1473_v15 = vor.u32 %v1966_v5, %v1472_v4 }
  0x26   :  { %939 = vmatpush.bf16.msra.mxu3 %v1713_v53  ;;  %v1939_v12 = vld [vmem:[#allocation5 + $0x8] sm:$0xf0]  ;;  %v1460_v13 = vld [vmem:[#allocation5 + $0xc0] sm:$0xf]  ;;  %v1689_v14 = vor.u32 %v2020_v9, %v1688_v6  ;;  %v1569_v16 = vor.u32 %v1990_v8, %v1568_v7  ;;  %v1676_v18 = vld [vmem:[#allocation5 + $0x270] sm:$0xf] }
  0x27   :  { %902 = vmatpush.bf16.msra.mxu0 %v1401_v50  ;;  %v1963_v17 = vld [vmem:[#allocation5 + $0xc8] sm:$0xf0]  ;;  %v2017_v19 = vld [vmem:[#allocation5 + $0x278] sm:$0xf0]  ;;  %v1556_v20 = vld [vmem:[#allocation5 + $0x180] sm:$0xf]  ;;  %v1365_v26 = vor.u32 %v1939_v12, %v1364_v11 }
  0x28   :  { %915 = vmatpush.bf16.msra.mxu1 %v1497_v54  ;;  %v1987_v21 = vld [vmem:[#allocation5 + $0x188] sm:$0xf0]  ;;  %v1832_v22 = vld [vmem:[#allocation5 + $0x3a8] sm:$0xf]  ;;  %v2056_v23 = vld [vmem:[#allocation5 + $0x3b0] sm:$0xf0]  ;;  %v1677_v29 = vor.u32 %v2017_v19, %v1676_v18  ;;  %v1461_v30 = vor.u32 %v1963_v17, %v1460_v13 }
  0x29   :  { %928 = vmatpush.bf16.msra.mxu2 %v1593_v55  ;;  %v1959_v24 = vld [vmem:[#allocation5 + $0xac] sm:$0xf]  ;;  %v1450_v25 = vld [vmem:[#allocation5 + $0xb4] sm:$0xf0]  ;;  %v1557_v31 = vor.u32 %v1987_v21, %v1556_v20  ;;  %v2014_v33 = vld [vmem:[#allocation5 + $0x260] sm:$0xf0]  ;;  %v1833_v34 = vor.u32 %v2056_v23, %v1832_v22 }
  0x2a   :  { %940 = vmatpush.bf16.msra.mxu3 %v1701_v1  ;;  %v1983_v27 = vld [vmem:[#allocation5 + $0x16c] sm:$0xf]  ;;  %v1546_v28 = vld [vmem:[#allocation5 + $0x174] sm:$0xf0]  ;;  %v1453_v35 = vor.u32 %v1959_v24, %v1450_v25  ;;  %v1820_v36 = vld [vmem:[#allocation5 + $0x390] sm:$0xf] }
  0x2b   :  { %903 = vmatpush.bf16.msra.mxu0 %v1389_v62  ;;  %v1664_v32 = vld [vmem:[#allocation5 + $0x258] sm:$0xf]  ;;  %v1549_v38 = vor.u32 %v1983_v27, %v1546_v28  ;;  %v2053_v39 = vld [vmem:[#allocation5 + $0x398] sm:$0xf0]  ;;  %v1956_v40 = vld [vmem:[#allocation5 + $0x94] sm:$0xf] }
  0x2c   :  { %916 = vmatpush.bf16.msra.mxu1 %v1485_v2  ;;  %v80_v37 = vld [vmem:[#allocation2] sm:$0xff]  ;;  %v1438_v41 = vld [vmem:[#allocation5 + $0x9c] sm:$0xf0]  ;;  %v1980_v43 = vld [vmem:[#allocation5 + $0x154] sm:$0xf]  ;;  %v1665_v45 = vor.u32 %v2014_v33, %v1664_v32  ;;  %v1821_v49 = vor.u32 %v2053_v39, %v1820_v36  ;;  %s2228_s15 = smov [#allocation10]  }
  0x2d   :  { %929 = vmatpush.bf16.msra.mxu2 %v1581_v3  ;;  %v2271_v42 = vpack.c.bf16 %v80_v37, %v80_v37  ;;  %v1534_v44 = vld [vmem:[#allocation5 + $0x15c] sm:$0xf0]  ;;  %v1808_v46 = vld [vmem:[#allocation5 + $0x378] sm:$0xf]  ;;  %v2011_v48 = vld [vmem:[#allocation5 + $0x248] sm:$0xf0]  ;;  %v1441_v50 = vor.u32 %v1956_v40, %v1438_v41 }
  0x2e   :  { %941 = vmatpush.bf16.msra.mxu3 %v1689_v14  ;;  %v1652_v47 = vld [vmem:[#allocation5 + $0x240] sm:$0xf]  ;;  %v2050_v51 = vld [vmem:[#allocation5 + $0x380] sm:$0xf0]  ;;  %v2007_v52 = vld [vmem:[#allocation5 + $0x22c] sm:$0xf]  ;;  %v1537_v54 = vor.u32 %v1980_v43, %v1534_v44 }
  0x2f   :  { %904 = vmatpush.bf16.msra.mxu0 %v1377_v10  ;;  %v1642_v53 = vld [vmem:[#allocation5 + $0x234] sm:$0xf0]  ;;  %v1953_v55 = vld [vmem:[#allocation5 + $0x7c] sm:$0xf]  ;;  %v1426_v56 = vld [vmem:[#allocation5 + $0x84] sm:$0xf0]  ;;  %v1653_v59 = vor.u32 %v2011_v48, %v1652_v47  ;;  %v1809_v1 = vor.u32 %v2050_v51, %v1808_v46 }
  0x30   :  { %917 = vmatpush.bf16.msra.mxu1 %v1473_v15  ;;  %v1977_v57 = vld [vmem:[#allocation5 + $0x13c] sm:$0xf]  ;;  %v1522_v58 = vld [vmem:[#allocation5 + $0x144] sm:$0xf0]  ;;  %v83_v61 = vld [vmem:[#allocation2 + $0x18] sm:$0xff]  ;;  %v1645_v63 = vor.u32 %v2007_v52, %v1642_v53  ;;  %v1429_v2 = vor.u32 %v1953_v55, %v1426_v56  ;;  %s1348_s16 = sshll.u32 %s2228_s15, 4  ;;  %s1349_s16 = int_to_ptr.vmem [resolvable:$true] %s1348_s16 }
  0x31   :  { %930 = vmatpush.bf16.msra.mxu2 %v1569_v16  ;;  %v82_v60 = vld [vmem:[#allocation2 + $0x10] sm:$0xff]  ;;  %v1796_v62 = vld [vmem:[#allocation5 + $0x360] sm:$0xf]  ;;  %v2004_v4 = vld [vmem:[#allocation5 + $0x214] sm:$0xf]  ;;  %v1525_v6 = vor.u32 %v1977_v57, %v1522_v58  ;;  %v2276_v9 = vpack.c.bf16 %v83_v61, %v83_v61  ;;  %s1350_s19 = sshll.u32 %s2312_s5, 4  ;;  %s1351_s19 = int_to_ptr.hbm [resolvable:$true] %s1350_s19 }
  0x32   :  { %942 = vmatpush.bf16.msra.mxu3 %v1677_v29  ;;  %v2274_v0 = vpack.c.bf16 %v82_v60, %v82_v60  ;;  %v2047_v3 = vld [vmem:[#allocation5 + $0x368] sm:$0xf0]  ;;  %v1630_v5 = vld [vmem:[#allocation5 + $0x21c] sm:$0xf0]  ;;  %v1950_v7 = vld [vmem:[#allocation5 + $0x64] sm:$0xf] }
  0x33   :  { %905 = vmatpush.bf16.msra.mxu0 %v1365_v26  ;;  %v1414_v8 = vld [vmem:[#allocation5 + $0x6c] sm:$0xf0]  ;;  %v81_v10 = vld [vmem:[#allocation2 + $0x8] sm:$0xff]  ;;  %v1633_v14 = vor.u32 %v2004_v4, %v1630_v5  ;;  %v1797_v15 = vor.u32 %v2047_v3, %v1796_v62  ;;  %v1784_v17 = vld [vmem:[#allocation5 + $0x348] sm:$0xf] }
  0x34   :  { %918 = vmatpush.bf16.msra.mxu1 %v1461_v30  ;;  %v1974_v11 = vld [vmem:[#allocation5 + $0x124] sm:$0xf]  ;;  %v1510_v12 = vld [vmem:[#allocation5 + $0x12c] sm:$0xf0]  ;;  %v2279_v13 = vpack.c.bf16 %v81_v10, %v81_v10  ;;  %v1417_v16 = vor.u32 %v1950_v7, %v1414_v8  ;;  %v2001_v18 = vld [vmem:[#allocation5 + $0x1fc] sm:$0xf] }
  0x35   :  { %931 = vmatpush.bf16.msra.mxu2 %v1557_v31  ;;  %v1618_v19 = vld [vmem:[#allocation5 + $0x204] sm:$0xf0]  ;;  %v1513_v20 = vor.u32 %v1974_v11, %v1510_v12  ;;  %v2044_v21 = vld [vmem:[#allocation5 + $0x350] sm:$0xf0]  ;;  %v1947_v22 = vld [vmem:[#allocation5 + $0x4c] sm:$0xf] }
  0x36   :  { %906 = vmatmul.bf16.vlgmr.msra.gmra.mxu0 %v2271_v42  ;;  %943 = vmatpush.bf16.msra.mxu3 %v1665_v45  ;;  %v1402_v23 = vld [vmem:[#allocation5 + $0x54] sm:$0xf0]  ;;  %v1971_v24 = vld [vmem:[#allocation5 + $0x10c] sm:$0xf]  ;;  %v1621_v26 = vor.u32 %v2001_v18, %v1618_v19  ;;  %v1785_v27 = vor.u32 %v2044_v21, %v1784_v17  ;;  %v1772_v29 = vld [vmem:[#allocation5 + $0x330] sm:$0xf] }
  0x37   :  { %950 = vmatpush.bf16.msrb.mxu0 %v1833_v34  ;;  %v1498_v25 = vld [vmem:[#allocation5 + $0x114] sm:$0xf0]  ;;  %919 = vmatmul.bf16.vlgmr.msra.gmra.mxu1 %v2279_v13  ;;  %v1405_v28 = vor.u32 %v1947_v22, %v1402_v23  ;;  %v1998_v30 = vld [vmem:[#allocation5 + $0x1e4] sm:$0xf]  ;;  %v1606_v31 = vld [vmem:[#allocation5 + $0x1ec] sm:$0xf0] }
  0x38   :  { %963 = vmatpush.bf16.msrb.mxu1 %v1453_v35  ;;  %932 = vmatmul.bf16.vlgmr.msra.gmra.mxu2 %v2274_v0  ;;  %v1501_v32 = vor.u32 %v1971_v24, %v1498_v25  ;;  %v2041_v33 = vld [vmem:[#allocation5 + $0x338] sm:$0xf0]  ;;  %v1944_v34 = vld [vmem:[#allocation5 + $0x34] sm:$0xf]  ;;  %v1390_v35 = vld [vmem:[#allocation5 + $0x3c] sm:$0xf0] }
  0x39   :  { %976 = vmatpush.bf16.msrb.mxu2 %v1549_v38  ;;  %v1968_v36 = vld [vmem:[#allocation5 + $0xf4] sm:$0xf]  ;;  %v1486_v37 = vld [vmem:[#allocation5 + $0xfc] sm:$0xf0]  ;;  %v1609_v38 = vor.u32 %v1998_v30, %v1606_v31  ;;  %v1773_v39 = vor.u32 %v2041_v33, %v1772_v29  ;;  %v1393_v40 = vor.u32 %v1944_v34, %v1390_v35  ;;  %v1760_v41 = vld [vmem:[#allocation5 + $0x318] sm:$0xf] }
  0x3a   :  { %944 = vmatpush.bf16.msra.mxu3 %v1653_v59  ;;  %v1995_v43 = vld [vmem:[#allocation5 + $0x1cc] sm:$0xf]  ;;  %v1594_v44 = vld [vmem:[#allocation5 + $0x1d4] sm:$0xf0]  ;;  %v1489_v45 = vor.u32 %v1968_v36, %v1486_v37  ;;  %v2038_v46 = vld [vmem:[#allocation5 + $0x320] sm:$0xf0] }
  0x3b   :  { %951 = vmatpush.bf16.msrb.mxu0 %v1821_v49  ;;  %v1941_v47 = vld [vmem:[#allocation5 + $0x1c] sm:$0xf]  ;;  %v1378_v48 = vld [vmem:[#allocation5 + $0x24] sm:$0xf0]  ;;  %v1748_v51 = vld [vmem:[#allocation5 + $0x300] sm:$0xf]  ;;  %v1597_v53 = vor.u32 %v1995_v43, %v1594_v44 }
  0x3c   :  { %964 = vmatpush.bf16.msrb.mxu1 %v1441_v50  ;;  %v1965_v49 = vld [vmem:[#allocation5 + $0xdc] sm:$0xf]  ;;  %v1474_v50 = vld [vmem:[#allocation5 + $0xe4] sm:$0xf0]  ;;  %v2035_v52 = vld [vmem:[#allocation5 + $0x308] sm:$0xf0]  ;;  %v1381_v55 = vor.u32 %v1941_v47, %v1378_v48 }
  0x3d   :  { %977 = vmatpush.bf16.msrb.mxu2 %v1537_v54  ;;  %945 = vmatmul.bf16.vlgmr.msra.gmra.mxu3 %v2276_v9  ;;  %v1761_v54 = vor.u32 %v2038_v46, %v1760_v41  ;;  %v1938_v56 = vld [vmem:[#allocation5 + $0x4] sm:$0xf]  ;;  %v1992_v57 = vld [vmem:[#allocation5 + $0x1b4] sm:$0xf]  ;;  %v1582_v58 = vld [vmem:[#allocation5 + $0x1bc] sm:$0xf0]  ;;  %v1477_v59 = vor.u32 %v1965_v49, %v1474_v50  ;;  %v1749_v7 = vor.u32 %v2035_v52, %v1748_v51 }
  0x3e   :  { %989 = vmatpush.bf16.msrb.mxu3 %v1645_v63  ;;  %v1366_v60 = vld [vmem:[#allocation5 + $0xc] sm:$0xf0]  ;;  %v1962_v61 = vld [vmem:[#allocation5 + $0xc4] sm:$0xf]  ;;  %v2031_v63 = vld [vmem:[#allocation5 + $0x2ec] sm:$0xf] }
  0x3f   :  { %952 = vmatpush.bf16.msrb.mxu0 %v1809_v1  ;;  %v1462_v62 = vld [vmem:[#allocation5 + $0xcc] sm:$0xf0]  ;;  %v1738_v1 = vld [vmem:[#allocation5 + $0x2f4] sm:$0xf0]  ;;  %v1961_v5 = vld [vmem:[#allocation5 + $0xb8] sm:$0xf0]  ;;  %v1369_v8 = vor.u32 %v1938_v56, %v1366_v60 }
  0x40   :  { %965 = vmatpush.bf16.msrb.mxu1 %v1429_v2  ;;  %v2055_v2 = vld [vmem:[#allocation5 + $0x3ac] sm:$0xf]  ;;  %v1834_v3 = vld [vmem:[#allocation5 + $0x3b4] sm:$0xf0]  ;;  %v1456_v4 = vld [vmem:[#allocation5 + $0xb0] sm:$0xf] }
  0x41   :  { %978 = vmatpush.bf16.msrb.mxu2 %v1525_v6  ;;  %v1585_v6 = vor.u32 %v1992_v57, %v1582_v58  ;;  %v84_v10 = vld [vmem:[#allocation2 + $0x20] sm:$0xff]  ;;  %v1570_v12 = vld [vmem:[#allocation5 + $0x1a4] sm:$0xf0]  ;;  %v1457_v17 = vor.u32 %v1961_v5, %v1456_v4  ;;  %v2028_v18 = vld [vmem:[#allocation5 + $0x2d4] sm:$0xf] }
  0x42   :  { %990 = vmatpush.bf16.msrb.mxu3 %v1633_v14  ;;  %v1989_v11 = vld [vmem:[#allocation5 + $0x19c] sm:$0xf]  ;;  %v1465_v14 = vor.u32 %v1962_v61, %v1462_v62  ;;  %v1726_v19 = vld [vmem:[#allocation5 + $0x2dc] sm:$0xf0]  ;;  %v2283_v21 = vpack.c.bf16 %v84_v10, %v84_v10  ;;  %v1444_v23 = vld [vmem:[#allocation5 + $0x98] sm:$0xf] }
  0x43   :  { %953 = vmatpush.bf16.msrb.mxu0 %v1797_v15  ;;  %v1741_v15 = vor.u32 %v2031_v63, %v1738_v1  ;;  %v1822_v22 = vld [vmem:[#allocation5 + $0x39c] sm:$0xf0]  ;;  %v1958_v24 = vld [vmem:[#allocation5 + $0xa0] sm:$0xf0]  ;;  %v1573_v25 = vor.u32 %v1989_v11, %v1570_v12  ;;  %v1552_v29 = vld [vmem:[#allocation5 + $0x170] sm:$0xf] }
  0x44   :  { %966 = vmatpush.bf16.msrb.mxu1 %v1417_v16  ;;  %v1837_v16 = vor.u32 %v2055_v2, %v1834_v3  ;;  %v1985_v30 = vld [vmem:[#allocation5 + $0x178] sm:$0xf0]  ;;  %v1714_v34 = vld [vmem:[#allocation5 + $0x2c4] sm:$0xf0]  ;;  %v1432_v37 = vld [vmem:[#allocation5 + $0x80] sm:$0xf] }
  0x45   :  { %979 = vmatpush.bf16.msrb.mxu2 %v1513_v20  ;;  %v2052_v20 = vld [vmem:[#allocation5 + $0x394] sm:$0xf]  ;;  %v2025_v33 = vld [vmem:[#allocation5 + $0x2bc] sm:$0xf]  ;;  %v1810_v36 = vld [vmem:[#allocation5 + $0x384] sm:$0xf0] }
  0x46   :  { %991 = vmatpush.bf16.msrb.mxu3 %v1621_v26  ;;  %v1986_v26 = vld [vmem:[#allocation5 + $0x184] sm:$0xf]  ;;  %v1825_v31 = vor.u32 %v2052_v20, %v1822_v22  ;;  %v2049_v35 = vld [vmem:[#allocation5 + $0x37c] sm:$0xf]  ;;  %v1717_v41 = vor.u32 %v2025_v33, %v1714_v34  ;;  %v1540_v43 = vld [vmem:[#allocation5 + $0x158] sm:$0xf] }
  0x47   :  { %954 = vmatpush.bf16.msrb.mxu0 %v1785_v27  ;;  %v1558_v27 = vld [vmem:[#allocation5 + $0x18c] sm:$0xf0]  ;;  %v1982_v44 = vld [vmem:[#allocation5 + $0x160] sm:$0xf0]  ;;  %v1420_v51 = vld [vmem:[#allocation5 + $0x68] sm:$0xf] }
  0x48   :  { %967 = vmatpush.bf16.msrb.mxu1 %v1405_v28  ;;  %v1729_v28 = vor.u32 %v2028_v18, %v1726_v19  ;;  %v2022_v47 = vld [vmem:[#allocation5 + $0x2a4] sm:$0xf]  ;;  %v1702_v48 = vld [vmem:[#allocation5 + $0x2ac] sm:$0xf0]  ;;  %v1952_v52 = vld [vmem:[#allocation5 + $0x70] sm:$0xf0] }
  0x49   :  { %980 = vmatpush.bf16.msrb.mxu2 %v1501_v32  ;;  %v1445_v32 = vor.u32 %v1958_v24, %v1444_v23  ;;  %v2046_v49 = vld [vmem:[#allocation5 + $0x364] sm:$0xf]  ;;  %v1798_v50 = vld [vmem:[#allocation5 + $0x36c] sm:$0xf0]  ;;  %v1979_v56 = vld [vmem:[#allocation5 + $0x148] sm:$0xf0]  ;;  %v1421_v58 = vor.u32 %v1952_v52, %v1420_v51 }
  0x4a   :  { %992 = vmatpush.bf16.msrb.mxu3 %v1609_v38  ;;  %v1955_v38 = vld [vmem:[#allocation5 + $0x88] sm:$0xf0]  ;;  %v1801_v57 = vor.u32 %v2046_v49, %v1798_v50  ;;  %v1690_v60 = vld [vmem:[#allocation5 + $0x294] sm:$0xf0]  ;;  %v1408_v63 = vld [vmem:[#allocation5 + $0x50] sm:$0xf] }
  0x4b   :  { %955 = vmatpush.bf16.msrb.mxu0 %v1773_v39  ;;  %v1561_v39 = vor.u32 %v1986_v26, %v1558_v27  ;;  %v1433_v46 = vor.u32 %v1955_v38, %v1432_v37  ;;  %v2043_v61 = vld [vmem:[#allocation5 + $0x34c] sm:$0xf]  ;;  %v1786_v62 = vld [vmem:[#allocation5 + $0x354] sm:$0xf0]  ;;  %v1949_v1 = vld [vmem:[#allocation5 + $0x58] sm:$0xf0] }
  0x4c   :  { %968 = vmatpush.bf16.msrb.mxu1 %v1393_v40  ;;  %v1553_v40 = vor.u32 %v1985_v30, %v1552_v29  ;;  %v2016_v4 = vld [vmem:[#allocation5 + $0x274] sm:$0xf]  ;;  %v1516_v5 = vld [vmem:[#allocation5 + $0x128] sm:$0xf]  ;;  %v1678_v10 = vld [vmem:[#allocation5 + $0x27c] sm:$0xf0] }
  0x4d   :  { %981 = vmatpush.bf16.msrb.mxu2 %v1489_v45  ;;  %v1813_v45 = vor.u32 %v2049_v35, %v1810_v36  ;;  %v2040_v11 = vld [vmem:[#allocation5 + $0x334] sm:$0xf]  ;;  %v1774_v12 = vld [vmem:[#allocation5 + $0x33c] sm:$0xf0]  ;;  %v1504_v18 = vld [vmem:[#allocation5 + $0x110] sm:$0xf] }
  0x4e   :  { %993 = vmatpush.bf16.msrb.mxu3 %v1597_v53  ;;  %v1541_v53 = vor.u32 %v1982_v44, %v1540_v43  ;;  %v1973_v19 = vld [vmem:[#allocation5 + $0x118] sm:$0xf0]  ;;  %v1777_v20 = vor.u32 %v2040_v11, %v1774_v12  ;;  %v1666_v24 = vld [vmem:[#allocation5 + $0x264] sm:$0xf0]  ;;  %v1384_v27 = vld [vmem:[#allocation5 + $0x20] sm:$0xf] }
  0x4f   :  { %956 = vmatpush.bf16.msrb.mxu0 %v1761_v54  ;;  %v1705_v54 = vor.u32 %v2022_v47, %v1702_v48  ;;  %v2013_v23 = vld [vmem:[#allocation5 + $0x25c] sm:$0xf]  ;;  %v1762_v26 = vld [vmem:[#allocation5 + $0x324] sm:$0xf0]  ;;  %v1505_v29 = vor.u32 %v1973_v19, %v1504_v18  ;;  %v1970_v33 = vld [vmem:[#allocation5 + $0x100] sm:$0xf0] }
  0x50   :  { %969 = vmatpush.bf16.msrb.mxu1 %v1381_v55  ;;  %v1528_v55 = vld [vmem:[#allocation5 + $0x140] sm:$0xf]  ;;  %v1669_v30 = vor.u32 %v2013_v23, %v1666_v24  ;;  %v1654_v36 = vld [vmem:[#allocation5 + $0x24c] sm:$0xf0]  ;;  %v2034_v37 = vld [vmem:[#allocation5 + $0x304] sm:$0xf] }
  0x51   :  { %982 = vmatpush.bf16.msrb.mxu2 %v1477_v59  ;;  %v2019_v59 = vld [vmem:[#allocation5 + $0x28c] sm:$0xf]  ;;  %v1529_v2 = vor.u32 %v1979_v56, %v1528_v55  ;;  %v1750_v38 = vld [vmem:[#allocation5 + $0x30c] sm:$0xf0]  ;;  %v2009_v43 = vld [vmem:[#allocation5 + $0x238] sm:$0xf0] }
  0x52   :  { %994 = vmatpush.bf16.msrb.mxu3 %v1585_v6  ;;  %v1693_v3 = vor.u32 %v2019_v59, %v1690_v60  ;;  %v1976_v6 = vld [vmem:[#allocation5 + $0x130] sm:$0xf0]  ;;  %v1744_v44 = vld [vmem:[#allocation5 + $0x2f0] sm:$0xf]  ;;  %v2057_v49 = vld [vmem:[#allocation5 + $0x3b8] sm:$0xf0]  ;;  %v1753_v50 = vor.u32 %v2034_v37, %v1750_v38 }
  0x53   :  { %957 = vmatpush.bf16.msrb.mxu0 %v1749_v7  ;;  %v1789_v7 = vor.u32 %v2043_v61, %v1786_v62  ;;  %v1840_v48 = vld [vmem:[#allocation5 + $0x3b0] sm:$0xf]  ;;  %v1480_v55 = vld [vmem:[#allocation5 + $0xe0] sm:$0xf]  ;;  %v1967_v56 = vld [vmem:[#allocation5 + $0xe8] sm:$0xf0] }
  0x54   :  { %970 = vmatpush.bf16.msrb.mxu1 %v1369_v8  ;;  %v1409_v8 = vor.u32 %v1949_v1, %v1408_v63  ;;  %v1732_v59 = vld [vmem:[#allocation5 + $0x2d8] sm:$0xf]  ;;  %v2030_v60 = vld [vmem:[#allocation5 + $0x2e0] sm:$0xf0]  ;;  %v1481_v63 = vor.u32 %v1967_v56, %v1480_v55  ;;  %v1816_v11 = vld [vmem:[#allocation5 + $0x380] sm:$0xf] }
  0x55   :  { %983 = vmatpush.bf16.msrb.mxu2 %v1465_v14  ;;  %v1396_v14 = vld [vmem:[#allocation5 + $0x38] sm:$0xf]  ;;  %v2054_v62 = vld [vmem:[#allocation5 + $0x3a0] sm:$0xf0]  ;;  %v2051_v12 = vld [vmem:[#allocation5 + $0x388] sm:$0xf0] }
  0x56   :  { %958 = vmatmul.bf16.vlgmr.msrb.gmra.mxu0 %v2283_v21  ;;  %995 = vmatpush.bf16.msrb.mxu3 %v1573_v25  ;;  %v2037_v25 = vld [vmem:[#allocation5 + $0x31c] sm:$0xf]  ;;  %v1828_v61 = vld [vmem:[#allocation5 + $0x398] sm:$0xf]  ;;  %v2000_v18 = vld [vmem:[#allocation5 + $0x1f0] sm:$0xf0]  ;;  %v1817_v19 = vor.u32 %v2051_v12, %v1816_v11 }
  0x57   :  { %1002 = vmatpush.bf16.msra.mxu0 %v1741_v15  ;;  %971 = vmatmul.bf16.vlgmr.msrb.gmra.mxu1 %v2271_v42  ;;  %v1946_v15 = vld [vmem:[#allocation5 + $0x40] sm:$0xf0]  ;;  %v1765_v34 = vor.u32 %v2037_v25, %v1762_v26  ;;  %v2065_v23 = vld [vmem:[#allocation8 + $0x38] sm:$0xff]  ;;  %v1804_v24 = vld [vmem:[#allocation5 + $0x368] sm:$0xf] }
  0x58   :  { %1015 = vmatpush.bf16.msra.mxu1 %v1837_v16  ;;  %984 = vmatmul.bf16.vlgmr.msrb.gmra.mxu2 %v2279_v13  ;;  %v1517_v16 = vor.u32 %v1976_v6, %v1516_v5  ;;  %v1397_v22 = vor.u32 %v1946_v15, %v1396_v14  ;;  %v1964_v5 = vld [vmem:[#allocation5 + $0xd0] sm:$0xf0]  ;;  %v1829_v6 = vor.u32 %v2054_v62, %v1828_v61  ;;  %v1588_v37 = vld [vmem:[#allocation5 + $0x1b8] sm:$0xf]  ;;  %v1564_v55 = vld [vmem:[#allocation5 + $0x188] sm:$0xf] }
  0x59   :  { %1028 = vmatpush.bf16.msra.mxu2 %v1457_v17  ;;  %v1681_v17 = vor.u32 %v2016_v4, %v1678_v10  ;;  %v1468_v4 = vld [vmem:[#allocation5 + $0xc8] sm:$0xf]  ;;  %v2027_v10 = vld [vmem:[#allocation5 + $0x2c8] sm:$0xf0]  ;;  %v2048_v25 = vld [vmem:[#allocation5 + $0x370] sm:$0xf0] }
  0x5a   :  { %996 = vmatpush.bf16.msrb.mxu3 %v1561_v39  ;;  %v1372_v39 = vld [vmem:[#allocation5 + $0x8] sm:$0xf]  ;;  %v1469_v14 = vor.u32 %v1964_v5, %v1468_v4  ;;  %v2036_v61 = vld [vmem:[#allocation5 + $0x310] sm:$0xf0]  ;;  %v2061_v4 = vld [vmem:[#allocation8 + $0x18] sm:$0xff] }
  0x5b   :  { %1003 = vmatpush.bf16.msra.mxu0 %v1729_v28  ;;  %v1943_v28 = vld [vmem:[#allocation5 + $0x28] sm:$0xf0]  ;;  %v2060_v5 = vld [vmem:[#allocation8 + $0x10] sm:$0xff]  ;;  %v2296_v11 = vld [vmem:[#allocation7] sm:$0x7] }
  0x5c   :  { %1016 = vmatpush.bf16.msra.mxu1 %v1825_v31  ;;  %v2010_v31 = vld [vmem:[#allocation5 + $0x244] sm:$0xf]  ;;  %v1385_v35 = vor.u32 %v1943_v28, %v1384_v27  ;;  %v1600_v27 = vld [vmem:[#allocation5 + $0x1d0] sm:$0xf]  ;;  %v1997_v28 = vld [vmem:[#allocation5 + $0x1d8] sm:$0xf0] }
  0x5d   :  { %1029 = vmatpush.bf16.msra.mxu2 %v1445_v32  ;;  %997 = vmatmul.bf16.vlgmr.msrb.gmra.mxu3 %v2274_v0  ;;  %v1492_v32 = vld [vmem:[#allocation5 + $0xf8] sm:$0xf]  ;;  %v1657_v47 = vor.u32 %v2010_v31, %v1654_v36  ;;  %v2021_v31 = vld [vmem:[#allocation5 + $0x298] sm:$0xf0]  ;;  %v252_v12 = vperm.slane %v2296_v11, 0 }
  0x5e   :  { %1041 = vmatpush.bf16.msra.mxu3 %v1553_v40  ;;  %v1940_v40 = vld [vmem:[#allocation5 + $0x10] sm:$0xf0] }
  0x5f   :  { %1004 = vmatpush.bf16.msra.mxu0 %v1717_v41  ;;  %v1648_v41 = vld [vmem:[#allocation5 + $0x230] sm:$0xf]  ;;  %v1373_v51 = vor.u32 %v1940_v40, %v1372_v39  ;;  %v1994_v39 = vld [vmem:[#allocation5 + $0x1c0] sm:$0xf0]  ;;  %v1684_v40 = vld [vmem:[#allocation5 + $0x278] sm:$0xf] }
  0x60   :  { %1017 = vmatpush.bf16.msra.mxu1 %v1813_v45  ;;  %v2033_v45 = vld [vmem:[#allocation5 + $0x2f8] sm:$0xf0]  ;;  %v1649_v52 = vor.u32 %v2009_v43, %v1648_v41  ;;  %v2018_v41 = vld [vmem:[#allocation5 + $0x280] sm:$0xf0]  ;;  %v1780_v43 = vld [vmem:[#allocation5 + $0x338] sm:$0xf] }
  0x61   :  { %1030 = vmatpush.bf16.msra.mxu2 %v1433_v46  ;;  %v1493_v46 = vor.u32 %v1970_v33, %v1492_v32  ;;  %v2064_v32 = vld [vmem:[#allocation8 + $0x30] sm:$0xff]  ;;  %v1792_v33 = vld [vmem:[#allocation5 + $0x350] sm:$0xf] }
  0x62   :  { %1042 = vmatpush.bf16.msra.mxu3 %v1541_v53  ;;  %v1745_v53 = vor.u32 %v2033_v45, %v1744_v44  ;;  %v2042_v44 = vld [vmem:[#allocation5 + $0x340] sm:$0xf0]  ;;  %v1589_v45 = vor.u32 %v1994_v39, %v1588_v37  ;;  %v2080_v37 = vld [vmem:[#allocation8 + $0xb0] sm:$0xff]  ;;  %v2079_v39 = vld [vmem:[#allocation8 + $0xa8] sm:$0xff] }
  0x63   :  { %1005 = vmatpush.bf16.msra.mxu0 %v1705_v54  ;;  %v1636_v54 = vld [vmem:[#allocation5 + $0x218] sm:$0xf] }
  0x64   :  { %1018 = vmatpush.bf16.msra.mxu1 %v1801_v57  ;;  %v1841_v57 = vor.u32 %v2057_v49, %v1840_v48  ;;  %v1991_v48 = vld [vmem:[#allocation5 + $0x1a8] sm:$0xf0]  ;;  %v1672_v49 = vld [vmem:[#allocation5 + $0x260] sm:$0xf] }
  0x65   :  { %1031 = vmatpush.bf16.msra.mxu2 %v1421_v58  ;;  %v2006_v58 = vld [vmem:[#allocation5 + $0x220] sm:$0xf0] }
  0x66   :  { %1043 = vmatpush.bf16.msra.mxu3 %v1529_v2  ;;  %v1637_v1 = vor.u32 %v2006_v58, %v1636_v54  ;;  %v1733_v2 = vor.u32 %v2030_v60, %v1732_v59  ;;  %v1660_v58 = vld [vmem:[#allocation5 + $0x248] sm:$0xf]  ;;  %v2012_v59 = vld [vmem:[#allocation5 + $0x250] sm:$0xf0] }
  0x67   :  { %1006 = vmatpush.bf16.msra.mxu0 %v1693_v3  ;;  %v1624_v3 = vld [vmem:[#allocation5 + $0x200] sm:$0xf]  ;;  %v1756_v60 = vld [vmem:[#allocation5 + $0x308] sm:$0xf] }
  0x68   :  { %1019 = vmatpush.bf16.msra.mxu1 %v1789_v7  ;;  %v2003_v7 = vld [vmem:[#allocation5 + $0x208] sm:$0xf0] }
  0x69   :  { %1032 = vmatpush.bf16.msra.mxu2 %v1409_v8  ;;  %v1720_v8 = vld [vmem:[#allocation5 + $0x2c0] sm:$0xf]  ;;  %v1625_v15 = vor.u32 %v2003_v7, %v1624_v3  ;;  %v2062_v3 = vld [vmem:[#allocation8 + $0x20] sm:$0xff] }
  0x6a   :  { %1044 = vmatpush.bf16.msra.mxu3 %v1517_v16  ;;  %v1721_v16 = vor.u32 %v2027_v10, %v1720_v8  ;;  %v2058_v8 = vld [vmem:[#allocation8] sm:$0xff]  ;;  %v2073_v10 = vld [vmem:[#allocation8 + $0x78] sm:$0xff] }
  0x6b   :  { %1007 = vmatpush.bf16.msra.mxu0 %v1681_v17  ;;  %v1612_v17 = vld [vmem:[#allocation5 + $0x1e8] sm:$0xf] }
  0x6c   :  { %1020 = vmatpush.bf16.msra.mxu1 %v1777_v20  ;;  %v1708_v20 = vld [vmem:[#allocation5 + $0x2a8] sm:$0xf] }
  0x6d   :  { %1033 = vmatpush.bf16.msra.mxu2 %v1397_v22  ;;  %v2024_v22 = vld [vmem:[#allocation5 + $0x2b0] sm:$0xf0] }
  0x6e   :  { %1045 = vmatpush.bf16.msra.mxu3 %v1505_v29  ;;  %v1709_v26 = vor.u32 %v2024_v22, %v1708_v20  ;;  %v1805_v29 = vor.u32 %v2048_v25, %v1804_v24 }
  0x6f   :  { %1008 = vmatpush.bf16.msra.mxu0 %v1669_v30  ;;  %v1696_v30 = vld [vmem:[#allocation5 + $0x290] sm:$0xf] }
  0x70   :  { %1021 = vmatpush.bf16.msra.mxu1 %v1765_v34  ;;  %v2045_v34 = vld [vmem:[#allocation5 + $0x358] sm:$0xf0]  ;;  %v1697_v36 = vor.u32 %v2021_v31, %v1696_v30 }
  0x71   :  { %1034 = vmatpush.bf16.msra.mxu2 %v1385_v35  ;;  %v1601_v35 = vor.u32 %v1997_v28, %v1600_v27  ;;  %v1793_v38 = vor.u32 %v2045_v34, %v1792_v33  ;;  %v2067_v27 = vld [vmem:[#allocation8 + $0x48] sm:$0xff]  ;;  %v2081_v34 = vld [vmem:[#allocation8 + $0xb8] sm:$0xff] }
  0x72   :  { %1046 = vmatpush.bf16.msra.mxu3 %v1493_v46  ;;  %v1685_v46 = vor.u32 %v2018_v41, %v1684_v40  ;;  %v253_v40 = vperm.slane %v2296_v11, 1 }
  0x73   :  { %1009 = vmatpush.bf16.msra.mxu0 %v1657_v47  ;;  %v1576_v47 = vld [vmem:[#allocation5 + $0x1a0] sm:$0xf] }
  0x74   :  { %1022 = vmatpush.bf16.msra.mxu1 %v1753_v50  ;;  %v2015_v50 = vld [vmem:[#allocation5 + $0x268] sm:$0xf0] }
  0x75   :  { %1035 = vmatpush.bf16.msra.mxu2 %v1373_v51  ;;  %v1768_v51 = vld [vmem:[#allocation5 + $0x320] sm:$0xf]  ;;  %v1673_v54 = vor.u32 %v2015_v50, %v1672_v49  ;;  %v2076_v49 = vld [vmem:[#allocation8 + $0x90] sm:$0xff] }
  0x76   :  { %1010 = vmatmul.bf16.vlgmr.msra.gmra.mxu0 %v2276_v9  ;;  %1047 = vmatpush.bf16.msra.mxu3 %v1481_v63  ;;  %v1661_v63 = vor.u32 %v2012_v59, %v1660_v58  ;;  %v2074_v58 = vld [vmem:[#allocation8 + $0x80] sm:$0xff] }
  0x77   :  { %1054 = vmatpush.bf16.msrb.mxu0 %v1649_v52  ;;  %1023 = vmatmul.bf16.vlgmr.msra.gmra.mxu1 %v2283_v21  ;;  %v2039_v52 = vld [vmem:[#allocation5 + $0x328] sm:$0xf0] }
  0x78   :  { %1067 = vmatpush.bf16.msrb.mxu1 %v1745_v53  ;;  %1036 = vmatmul.bf16.vlgmr.msra.gmra.mxu2 %v2271_v42  ;;  %v1613_v42 = vor.u32 %v2000_v18, %v1612_v17  ;;  %v1577_v53 = vor.u32 %v1991_v48, %v1576_v47  ;;  %v1769_v56 = vor.u32 %v2039_v52, %v1768_v51  ;;  %v2070_v18 = vld [vmem:[#allocation8 + $0x60] sm:$0xff] }
  0x79   :  { %1080 = vmatpush.bf16.msrb.mxu2 %v1841_v57  ;;  %v1988_v57 = vld [vmem:[#allocation5 + $0x190] sm:$0xf0] }
  0x7a   :  { %1048 = vmatpush.bf16.msra.mxu3 %v1469_v14  ;;  %v1565_v62 = vor.u32 %v1988_v57, %v1564_v55 }
  0x7b   :  { %1055 = vmatpush.bf16.msrb.mxu0 %v1637_v1  ;;  %v1757_v1 = vor.u32 %v2036_v61, %v1756_v60 }
  0x7c   :  { %1068 = vmatpush.bf16.msrb.mxu1 %v1733_v2  ;;  %v2063_v2 = vld [vmem:[#allocation8 + $0x28] sm:$0xff] }
  0x7d   :  { %1081 = vmatpush.bf16.msrb.mxu2 %v1829_v6  ;;  %1049 = vmatmul.bf16.vlgmr.msra.gmra.mxu3 %v2279_v13  ;;  %v1781_v13 = vor.u32 %v2042_v44, %v1780_v43  ;;  %v2059_v6 = vld [vmem:[#allocation8 + $0x8] sm:$0xff]  ;;  %v2078_v44 = vld [vmem:[#allocation8 + $0xa0] sm:$0xff] }
  0x7e   :  { %1295 = vmatpush.bf16.msrb.mxu3 %v2065_v23  ;;  %v2069_v23 = vld [vmem:[#allocation8 + $0x58] sm:$0xff] }
  0x7f   :  { %1056 = vmatpush.bf16.msrb.mxu0 %v1625_v15  ;;  %v2071_v15 = vld [vmem:[#allocation8 + $0x68] sm:$0xff] }
  0x80   :  { %1069 = vmatpush.bf16.msrb.mxu1 %v1721_v16 }
  0x81   :  { %1082 = vmatpush.bf16.msrb.mxu2 %v1817_v19 }
  0x82   :  { %1296 = vmatpush.bf16.msrb.mxu3 %v2064_v32  ;;  %v2066_v32 = vld [vmem:[#allocation8 + $0x40] sm:$0xff] }
  0x83   :  { %1057 = vmatpush.bf16.msrb.mxu0 %v1613_v42  ;;  %v2068_v42 = vld [vmem:[#allocation8 + $0x50] sm:$0xff] }
  0x84   :  { %1070 = vmatpush.bf16.msrb.mxu1 %v1709_v26 }
  0x85   :  { %1083 = vmatpush.bf16.msrb.mxu2 %v1805_v29 }
  0x86   :  { %1297 = vmatpush.bf16.msrb.mxu3 %v2063_v2 }
  0x87   :  { %1058 = vmatpush.bf16.msrb.mxu0 %v1601_v35 }
  0x88   :  { %1071 = vmatpush.bf16.msrb.mxu1 %v1697_v36 }
  0x89   :  { %1084 = vmatpush.bf16.msrb.mxu2 %v1793_v38 }
  0x8a   :  { %1298 = vmatpush.bf16.msrb.mxu3 %v2062_v3 }
  0x8b   :  { %1059 = vmatpush.bf16.msrb.mxu0 %v1589_v45 }
  0x8c   :  { %1072 = vmatpush.bf16.msrb.mxu1 %v1685_v46  ;;  %v2077_v46 = vld [vmem:[#allocation8 + $0x98] sm:$0xff] }
  0x8d   :  { %1085 = vmatpush.bf16.msrb.mxu2 %v1781_v13 }
  0x8e   :  { %1299 = vmatpush.bf16.msrb.mxu3 %v2061_v4 }
  0x8f   :  { %1060 = vmatpush.bf16.msrb.mxu0 %v1577_v53 }
  0x90   :  { %1073 = vmatpush.bf16.msrb.mxu1 %v1673_v54  ;;  %v2075_v54 = vld [vmem:[#allocation8 + $0x88] sm:$0xff] }
  0x91   :  { %1086 = vmatpush.bf16.msrb.mxu2 %v1769_v56 }
  0x92   :  { %1300 = vmatpush.bf16.msrb.mxu3 %v2060_v5 }
  0x93   :  { %1061 = vmatpush.bf16.msrb.mxu0 %v1565_v62 }
  0x94   :  { %1074 = vmatpush.bf16.msrb.mxu1 %v1661_v63  ;;  %v254_v63 = vperm.slane %v2296_v11, 2  ;;  %v2091_v11 = vld [vmem:[%s2311_s4] ss:$0 sm:$0xff] }
  0x95   :  { %1087 = vmatpush.bf16.msrb.mxu2 %v1757_v1 }
  0x96   :  { %1062 = vmatmul.bf16.vlgmr.msrb.gmra.mxu0 %v2274_v0  ;;  %1301 = vmatpush.bf16.msrb.mxu3 %v2059_v6  ;;  %v2072_v0 = vld [vmem:[#allocation8 + $0x70] sm:$0xff] }
  0x97   :  { %1075 = vmatmul.bf16.vlgmr.msrb.gmra.mxu1 %v2276_v9  ;;  %1308 = vmatpush.bf16.msra.mxu0 %v2073_v10 }
  0x98   :  { %1088 = vmatmul.bf16.vlgmr.msrb.gmra.mxu2 %v2283_v21  ;;  %1321 = vmatpush.bf16.msra.mxu1 %v2081_v34 }
  0x9a   :  { %1302 = vmatpush.bf16.msrb.mxu3 %v2058_v8 }
  0x9b   :  { %1309 = vmatpush.bf16.msra.mxu0 %v2072_v0 }
  0x9c   :  { %1322 = vmatpush.bf16.msra.mxu1 %v2080_v37 }
  0x9f   :  { %1310 = vmatpush.bf16.msra.mxu0 %v2071_v15 }
  0xa0   :  { %1323 = vmatpush.bf16.msra.mxu1 %v2079_v39 }
  0xa3   :  { %1311 = vmatpush.bf16.msra.mxu0 %v2070_v18 }
  0xa4   :  { %1324 = vmatpush.bf16.msra.mxu1 %v2078_v44 }
  0xa7   :  { %1312 = vmatpush.bf16.msra.mxu0 %v2069_v23 }
  0xa8   :  { %1325 = vmatpush.bf16.msra.mxu1 %v2077_v46 }
  0xab   :  { %1313 = vmatpush.bf16.msra.mxu0 %v2068_v42 }
  0xac   :  { %1326 = vmatpush.bf16.msra.mxu1 %v2076_v49 }
  0xaf   :  { %1314 = vmatpush.bf16.msra.mxu0 %v2067_v27 }
  0xb0   :  { %1327 = vmatpush.bf16.msra.mxu1 %v2075_v54 }
  0xb3   :  { %v907_v7 = vpop.f32.mrf.mxu0  ;;  %1315 = vmatpush.bf16.msra.mxu0 %v2066_v32 }
  0xb4   :  { %v920_v21 = vpop.f32.mrf.mxu1  ;;  %v908_v17 = vadd.f32 %v907_v7, %v252_v12  ;;  %1328 = vmatpush.bf16.msra.mxu1 %v2074_v58 }
  0xb6   :  { %v921_v20 = vadd.f32 %v920_v21, %v908_v17 }
  0xbb   :  { %v909_v9 = vpop.f32.mrf.mxu0  ;;  %v933_v14 = vpop.f32.mrf.mxu2 }
  0xbc   :  { %v922_v19 = vpop.f32.mrf.mxu1  ;;  %v934_v25 = vadd.f32 %v933_v14, %v921_v20 }
  0xbd   :  { %v1334_v19 = vlaneseq }
  0xc0   :  { %v946_v16 = vpop.f32.mrf.mxu3 }
  0xc1   :  { %v947_v26 = vadd.f32 %v946_v16, %v934_v25 }
  0xc3   :  { %v935_v22 = vpop.f32.mrf.mxu2 }
  0xc4   :  { %v1335_v22 = vand.u32 127, %v1334_v19 }
  0xc6   :  { %vm1336_vm0 = vcmp.ge.s32.totalorder %v1335_v22, 8  ;;  %vm1337_vm1 = vcmp.lt.s32.totalorder %v1335_v22, 16 }
  0xc7   :  { %vm1338_vm2 = vmand %vm1336_vm0, %vm1337_vm1 }
  0xc8   :  { %v948_v24 = vpop.f32.mrf.mxu3 }
  0xd3   :  { %v959_v28 = vpop.f32.mrf.mxu0 }
  0xd4   :  { %v960_v29 = vadd.f32 %v959_v28, %v947_v26  ;;  %v972_v30 = vpop.f32.mrf.mxu1 }
  0xd5   :  { %v973_v45 = vadd.f32 %v972_v30, %v253_v40 }
  0xd6   :  { %v1093_v31 = vmax.f32 %v960_v29, 0.0 }
  0xd8   :  { %v1096_v33 = vpack.c.bf16 %v1093_v31, %v1093_v31 }
  0xda   :  { %1303 = vmatmul.bf16.vlgmr.msrb.gmra.mxu3 %v1096_v33 }
  0xdb   :  { %v985_v35 = vpop.f32.mrf.mxu2  ;;  %v961_v36 = vpop.f32.mrf.mxu0 }
  0xdc   :  { %v974_v38 = vpop.f32.mrf.mxu1  ;;  %v986_v47 = vadd.f32 %v985_v35, %v973_v45 }
  0xe0   :  { %v998_v41 = vpop.f32.mrf.mxu3 }
  0xe1   :  { %v999_v48 = vadd.f32 %v998_v41, %v986_v47 }
  0xe3   :  { %v987_v43 = vpop.f32.mrf.mxu2 }
  0xe8   :  { %v1000_v13 = vpop.f32.mrf.mxu3 }
  0xf3   :  { %v1011_v50 = vpop.f32.mrf.mxu0 }
  0xf4   :  { %v1012_v51 = vadd.f32 %v1011_v50, %v999_v48  ;;  %v1024_v52 = vpop.f32.mrf.mxu1 }
  0xf6   :  { %v1025_v53 = vadd.f32 %v1024_v52, %v1012_v51 }
  0xf8   :  { %v1094_v55 = vmax.f32 %v1025_v53, 0.0 }
  0xfa   :  { %v1097_v56 = vpack.c.bf16 %v1094_v55, %v1094_v55 }
  0xfb   :  { %v1037_v57 = vpop.f32.mrf.mxu2  ;;  %v1013_v59 = vpop.f32.mrf.mxu0 }
  0xfc   :  { %1316 = vmatmul.bf16.vlgmr.msra.gmra.mxu0 %v1097_v56  ;;  %v1026_v60 = vpop.f32.mrf.mxu1  ;;  %v1038_v2 = vadd.f32 %v1037_v57, %v254_v63 }
 0x100   :  { %v1050_v62 = vpop.f32.mrf.mxu3 }
 0x101   :  { %v1051_v3 = vadd.f32 %v1050_v62, %v1038_v2 }
 0x103   :  { %v1039_v61 = vpop.f32.mrf.mxu2 }
 0x108   :  { %v1052_v1 = vpop.f32.mrf.mxu3 }
 0x113   :  { %v1063_v4 = vpop.f32.mrf.mxu0 }
 0x114   :  { %v1076_v5 = vpop.f32.mrf.mxu1  ;;  %v1064_v6 = vadd.f32 %v1063_v4, %v1051_v3 }
 0x116   :  { %v1077_v7 = vadd.f32 %v1076_v5, %v1064_v6 }
 0x11b   :  { %v1089_v8 = vpop.f32.mrf.mxu2  ;;  %v1065_v0 = vpop.f32.mrf.mxu0 }
 0x11c   :  { %v1090_v10 = vadd.f32 %v1089_v8, %v1077_v7  ;;  %v1078_v9 = vpop.f32.mrf.mxu1 }
 0x11e   :  { %v1095_v21 = vmax.f32 %v1090_v10, 0.0 }
 0x120   :  { %v1098_v12 = vpack.c.bf16 %v1095_v21, %v1095_v21 }
 0x122   :  { %1329 = vmatmul.bf16.vlgmr.msra.gmra.mxu1 %v1098_v12 }
 0x123   :  { %v1091_v14 = vpop.f32.mrf.mxu2 }
 0x15d   :  { %v1304_v15 = vpop.f32.mrf.mxu3 }
 0x15e   :  { %v1305_v20 = vadd.f32 %v2091_v11, %v1304_v15 }
 0x165   :  { %v1306_v16 = vpop.f32.mrf.mxu3 }
 0x179   :  { %v1317_v17 = vpop.f32.mrf.mxu0 }
 0x17a   :  { %v1318_v23 = vadd.f32 %v1317_v17, %v1305_v20 }
 0x181   :  { %v1319_v18 = vpop.f32.mrf.mxu0 }
 0x19f   :  { %v1330_v24 = vpop.f32.mrf.mxu1 }
 0x1a0   :  { %v1331_v25 = vadd.f32 %v1330_v24, %v1318_v23 }
 0x1a2   :  { %v1339_v42 = vmax.f32 %v1331_v25, -20.0 }
 0x1a4   :  { %v1340_v26 = vmin.f32 %v1339_v42, 2.0 }
 0x1a6   :  { %v1341_v27 = vsel %vm1338_vm2, %v1340_v26, %v1331_v25 }
 0x1a7   :  { %v1332_v28 = vpop.f32.mrf.mxu1  ;;  %1342 = vst [vmem:[#allocation10] sm:$0xff] %v1341_v27 }
 0x1a8   :  { %1353 = dma.vmem_to_hbm [thread:$0]  %s1349_s16, 128, %s1351_s19, [#allocation4]  }
 0x1a9   :  { %2218 = dma.done.wait [#allocation4], 128  }
 0x1aa   :  { %2219 = vsyncadd [#allocation4], 4294967168 }
 0x1ab   :  { %1358 = vsyncpa [#allocation3], 1 }
 0x1ac   :  { %1359 = vsyncpa [#allocation6], 1 }
 0x1ad   :  { %1360 = vsyncpa [#allocation9], 1 }
 0x1ae   :  { %1361 = vsyncpa [#allocation4], 1 }

</bundles_post_ra>
